<compile_context>
chip_gen: v7x
topology: tpu7x:2x2x1
jax: 0.10.0
libtpu: 0.0.40
codegen_flags: <defaults>
</compile_context>

<pallas_src>
import math
from functools import partial

import jax
import jax.numpy as jnp
from jax.experimental import pallas as pl
from jax.experimental.pallas import tpu as pltpu

_MIB = 1024 * 1024


# ----------------------------------------------------------------------------
# Buffer construction (deterministic, mirrors the PyTorch __init__).
# Build ONCE at init; returns a flat (maxlen, emb_size) table.
# ----------------------------------------------------------------------------
def make_pos_embedding(emb_size: int, maxlen: int = 6000,
                       dtype=jnp.float32) -> jnp.ndarray:
    assert emb_size % 2 == 0, "emb_size must be even (same as the torch reference)"
    den = jnp.exp(-jnp.arange(0, emb_size, 2, dtype=jnp.float32)
                  * (math.log(10000.0) / emb_size))                 # (E/2,)
    pos = jnp.arange(maxlen, dtype=jnp.float32)[:, None]            # (maxlen, 1)
    ang = pos * den[None, :]                                        # (maxlen, E/2)
    pe = jnp.zeros((maxlen, emb_size), dtype=jnp.float32)
    pe = pe.at[:, 0::2].set(jnp.sin(ang))
    pe = pe.at[:, 1::2].set(jnp.cos(ang))
    return pe.astype(dtype)                                         # (maxlen, E)


# ----------------------------------------------------------------------------
# Kernel: one full-width lane-dense add + store per grid step.
#   x_ref / o_ref: (seq_tile, b_tile*E)      pos_ref: (seq_tile, E)
# ----------------------------------------------------------------------------
def _posenc_kernel(x_ref, pos_ref, o_ref, *, b_tile: int):
    pe = pos_ref[...].astype(jnp.float32)                 # (seq_tile, E)
    if b_tile > 1:
        pe = jnp.tile(pe, (1, b_tile))                    # (seq_tile, b_tile*E)
    o_ref[...] = (x_ref[...].astype(jnp.float32) + pe).astype(o_ref.dtype)


# ----------------------------------------------------------------------------
# Generation-aware VMEM budget (double-buffered pipeline footprint / scoped cap)
# ----------------------------------------------------------------------------
def _vmem_budget():
    try:
        cap = int(pltpu.get_tpu_info().vmem_capacity_bytes)
    except Exception:
        cap = 64 * _MIB                                   # conservative (v7x-safe)
    if cap <= 64 * _MIB:                                  # v7x-class: 64 MiB / TC
        return 40 * _MIB, 48 * _MIB
    return 56 * _MIB, 64 * _MIB                           # v5e / v6e: 128 MiB


# ----------------------------------------------------------------------------
# Wrapper
# ----------------------------------------------------------------------------
def positional_encoding(token_embedding: jnp.ndarray,
                        pos_embedding: jnp.ndarray,
                        *,
                        seq_tile: int | None = None,
                        target_block_bytes: int = 8 * _MIB) -> jnp.ndarray:
    """token_embedding: (S, B, E);  pos_embedding: (maxlen, E) or (maxlen, 1, E)."""
    S, B, E = token_embedding.shape
    if pos_embedding.ndim == 3:                           # accept torch-style buffer
        pos_embedding = pos_embedding.reshape(pos_embedding.shape[0],
                                              pos_embedding.shape[-1])
    assert pos_embedding.shape[0] >= S and pos_embedding.shape[1] == E

    x_itemsize = token_embedding.dtype.itemsize
    pos_itemsize = pos_embedding.dtype.itemsize
    sublane = {4: 8, 2: 16, 1: 32}.get(x_itemsize, 8)     # dtype-packed sublane mult

    pipeline_budget, vmem_limit = _vmem_budget()

    # Double-buffered pipeline bytes per sequence row for a given batch tile:
    # 2 x (x block + out block) + 2 x pos block.
    def _rows_bytes(bt: int) -> int:
        return 4 * bt * E * x_itemsize + 2 * E * pos_itemsize

    # Block the batch (lane) axis only if even a single sublane-aligned row tile
    # would bust the VMEM budget AND the lane width stays 128-aligned.
    b_tile = B
    if sublane * _rows_bytes(B) > pipeline_budget and E % 128 == 0 and B > 1:
        b_tile = max(1, min(B, pipeline_budget // max(1, sublane * _rows_bytes(1))))

    if seq_tile is None:
        row_bytes = b_tile * E * x_itemsize
        seq_tile = max(1, min(target_block_bytes // max(row_bytes, 1),
                              pipeline_budget // max(_rows_bytes(b_tile), 1)))
        # Guarantee >= 2 grid steps along seq when S permits (megacore + overlap).
        if S >= 2 * sublane:
            seq_tile = min(seq_tile, pl.cdiv(S, 2))
    seq_tile = int(seq_tile)
    if seq_tile >= S:
        seq_tile = S                                      # single block == full dim
    else:
        seq_tile = max(sublane, (seq_tile // sublane) * sublane)

    # Positional table is passed whole (BlockSpec selects rows); only for a tiny,
    # sublane-unaligned single-block S do we slice so block dims == full dims.
    pos2 = pos_embedding if seq_tile % 8 == 0 else pos_embedding[:S]

    x2 = token_embedding.reshape(S, B * E)                # free, C-contiguous
    grid = (pl.cdiv(S, seq_tile), pl.cdiv(B, b_tile))     # ragged tails masked

    cost = pl.CostEstimate(
        flops=S * B * E,
        transcendentals=0,
        bytes_accessed=2 * S * B * E * x_itemsize + S * E * pos_itemsize,
    )

    out2 = pl.pallas_call(
        partial(_posenc_kernel, b_tile=b_tile),
        out_shape=jax.ShapeDtypeStruct((S, B * E), token_embedding.dtype),
        grid=grid,
        in_specs=[
            pl.BlockSpec((seq_tile, b_tile * E), lambda i, j: (i, j)),  # activation
            pl.BlockSpec((seq_tile, E), lambda i, j: (i, 0)),           # positional
        ],
        out_specs=pl.BlockSpec((seq_tile, b_tile * E), lambda i, j: (i, j)),
        compiler_params=pltpu.CompilerParams(
            dimension_semantics=("parallel", "parallel"),
            vmem_limit_bytes=vmem_limit),
        cost_estimate=cost,
        input_output_aliases={0: 0},                      # in-place when donated
    )(x2, pos2)

    return out2.reshape(S, B, E)


# ----------------------------------------------------------------------------
# Demo / smoke test
# ----------------------------------------------------------------------------
if __name__ == "__main__":
    SEQ, BATCH, EMB = 8, 2, 32
    MAXLEN = 6000
    DROPOUT_P = 0.1  # identity in eval mode

    key = jax.random.PRNGKey(0)
    token_embedding = jax.random.normal(key, (SEQ, BATCH, EMB), dtype=jnp.float32)
    pos_table = make_pos_embedding(EMB, MAXLEN)           # (MAXLEN, EMB), built once

    out = positional_encoding(token_embedding, pos_table)
    out = jax.block_until_ready(out)
    ref = token_embedding + pos_table[:SEQ][:, None, :]
    assert out.shape == (SEQ, BATCH, EMB)
    assert jnp.allclose(out, ref, atol=1e-6, rtol=1e-6)

    # Multi-step grid + ragged-tail path (grid > 1, S % tile != 0).
    S2 = 36
    x2 = jax.random.normal(jax.random.PRNGKey(0), (S2, BATCH, EMB), dtype=jnp.float32)
    out2 = jax.block_until_ready(positional_encoding(x2, pos_table, seq_tile=8))
    ref2 = x2 + pos_table[:S2][:, None, :]
    assert jnp.allclose(out2, ref2, atol=1e-6, rtol=1e-6)

    # Also exercise the torch-style (maxlen, 1, E) buffer path + auto tiling.
    out3 = jax.block_until_ready(positional_encoding(x2, pos_table[:, None, :]))
    assert jnp.allclose(out3, ref2, atol=1e-6, rtol=1e-6)

    print("KERNEL_OK")
</pallas_src>

<mosaic_0001>
module attributes {stable_mosaic.version = 11 : i64} {
  func.func @_posenc_kernel(%arg0: i32, %arg1: i32, %arg2: memref<8x64xf32, #tpu.memory_space<vmem>>, %arg3: memref<8x32xf32, #tpu.memory_space<vmem>>, %arg4: memref<8x64xf32, #tpu.memory_space<vmem>>) attributes {dimension_semantics = [#tpu.dimension_semantics<parallel>, #tpu.dimension_semantics<parallel>], iteration_bounds = array<i64: 1, 1>, scalar_prefetch = 0 : i64, scratch_operands = 0 : i64, tpu.core_type = #tpu.core_type<tc>, window_params = [{transform_indices = @transform_0, window_bounds = array<i64: 8, 64>}, {transform_indices = @transform_1, window_bounds = array<i64: 8, 32>}, {transform_indices = @transform_2, window_bounds = array<i64: 8, 64>}]} {
    %c0 = arith.constant 0 : index
    %c0_0 = arith.constant 0 : index
    %0 = vector.load %arg3[%c0, %c0_0] : memref<8x32xf32, #tpu.memory_space<vmem>>, vector<8x32xf32>
    %1 = tpu.concatenate %0, %0 in 1 : vector<8x32xf32>, vector<8x32xf32> -> vector<8x64xf32>
    %c0_1 = arith.constant 0 : index
    %c0_2 = arith.constant 0 : index
    %2 = vector.load %arg2[%c0_1, %c0_2] : memref<8x64xf32, #tpu.memory_space<vmem>>, vector<8x64xf32>
    %3 = arith.addf %2, %1 : vector<8x64xf32>
    %c0_3 = arith.constant 0 : index
    %c0_4 = arith.constant 0 : index
    %4 = vector.load %arg4[%c0_3, %c0_4] : memref<8x64xf32, #tpu.memory_space<vmem>>, vector<8x64xf32>
    tpu.vector_store %arg4[%c0_3, %c0_4], %3 {strides = array<i32>} : memref<8x64xf32, #tpu.memory_space<vmem>>, vector<8x64xf32>,
    return
  }
  func.func @transform_0(%arg0: i32, %arg1: i32) -> (i32, i32) {
    %c0_i32 = arith.constant 0 : i32
    return %arg0, %arg1 : i32, i32
  }
  func.func @transform_1(%arg0: i32, %arg1: i32) -> (i32, i32) {
    %c0_i32 = arith.constant 0 : i32
    %c0_i32_0 = arith.constant 0 : i32
    return %arg0, %c0_i32 : i32, i32
  }
  func.func @transform_2(%arg0: i32, %arg1: i32) -> (i32, i32) {
    %c0_i32 = arith.constant 0 : i32
    return %arg0, %arg1 : i32, i32
  }
}

</mosaic_0001>

<bundles_post_ra>
// kernel: tpu_custom_call.1
= control target key start
LH: loop header
LB: loop body
LE: loop exit
PB: predicated region body
PF: predicated region fallthrough
CT: control target
= control target key end

     0   :  { %7 = vsyncpa [#allocation3], 0  ;;  %s146_s0 = inlined_call_operand.hbm [shape: f32[8,64], index: 0, kind: input, shape index: {}, may-alias: {0,2}]   ;;  %s147_s1 = inlined_call_operand.vmem [shape: f32[6000,32], index: 1, kind: input, shape index: {}]   ;;  %s148_s2 = inlined_call_operand.hbm [shape: f32[8,64], index: 2, kind: output, shape index: {}, may-alias: {0,2}]  }
   0x1   :  { %8 = vsyncpa [#allocation4], 0  ;;  %s101_s9 = smov [#allocation2]   ;;  %s53_s13 = scalar_lea.hbm %s146_s0, 128 }
   0x2   :  { %s15_s10 = sshll.u32 %s101_s9, 4  ;;  %p54_p0 = scmp.ne.s32.totalorder %s146_s0, %s53_s13  ;;  %s16_s10 = int_to_ptr.vmem [resolvable:$true] %s15_s10 }
   0x3   :  { %p57_p1 = scmp.lt.u32.totalorder %s53_s13, %s146_s0 }
   0x5   :  { %p59_p2 = pnand %p57_p1, %p54_p0 }
   0x7   :  { %62 = shalt.err (!%p59_p2)
}
   0x8   :  { %s63_s18 = scalar_lea.vmem %s16_s10, 128  ;;  %p68_p4 = scmp.lt.s32.totalorder %s16_s10, %s16_s10 }
   0x9   :  { %p64_p3 = scmp.ne.s32.totalorder %s16_s10, %s63_s18  ;;  %p69_p5 = scmp.lt.s32.totalorder %s63_s18, %s63_s18 }
   0xb   :  { %p70_p6 = por %p69_p5, %p68_p4 }
   0xd   :  { %p71_p7 = pnand %p70_p6, %p64_p3 }
   0xf   :  { %74 = shalt.err (!%p71_p7)
}
  0x10   :  { %18 = dma.hbm_to_vmem [thread:$0]  %s146_s0, 128, %s16_s10, [#allocation3]  }
  0x11   :  { %97 = dma.done.wait [#allocation3], 128  }
  0x12   :  { %98 = vsyncadd [#allocation3], 4294967168  ;;  %v24_v0 = vld [vmem:[%s147_s1] sm:$0xff]  ;;  %s102_s23 = smov 32   ;;  %vm29_vm0 = vcmask 261120   ;;  %s103_s24 = smov [#allocation5]  }
  0x13   :  { %26 = vrot.lane.b32.xlu0 %v24_v0, %s102_s23  ;;  %v31_v1 = vld [vmem:[#allocation2] sm:$0xff]  ;;  %s41_s25 = sshll.u32 %s103_s24, 4  ;;  %vm33_vm1 = vcmask 523264   ;;  %s42_s25 = int_to_ptr.vmem [resolvable:$true] %s41_s25 }
  0x14   :  { %s75_s26 = scalar_lea.vmem %s42_s25, 128  ;;  %p80_p9 = scmp.lt.s32.totalorder %s42_s25, %s42_s25 }
  0x15   :  { %p76_p8 = scmp.ne.s32.totalorder %s42_s25, %s75_s26  ;;  %p81_p10 = scmp.lt.s32.totalorder %s75_s26, %s75_s26 }
  0x17   :  { %p82_p11 = por %p81_p10, %p80_p9 }
  0x19   :  { %p83_p12 = pnand %p82_p11, %p76_p8 }
  0x85   :  { %v27_v2 = vpop.permute.xlu0 %26 }
  0x86   :  { %v30_v3 = vsel %vm29_vm0, %v24_v0, %v27_v2 }
  0x87   :  { %v32_v4 = vadd.f32 %v31_v1, %v30_v3 }
  0x89   :  { %34 = vst.msk [vmem:[#allocation5] sm:$0xff] %vm33_vm1, %v32_v4 }
  0x8a   :  { %86 = shalt.err (!%p83_p12)
}
  0x8b   :  { %s87_s27 = scalar_lea.hbm %s148_s2, 128 }
  0x8c   :  { %p88_p13 = scmp.ne.s32.totalorder %s148_s2, %s87_s27  ;;  %p91_p0 = scmp.lt.u32.totalorder %s87_s27, %s148_s2 }
  0x8e   :  { %p93_p1 = pnand %p91_p0, %p88_p13 }
  0x90   :  { %96 = shalt.err (!%p93_p1)
}
  0x91   :  { %44 = dma.vmem_to_hbm [thread:$0]  %s42_s25, 128, %s148_s2, [#allocation4]  }
  0x92   :  { %99 = dma.done.wait [#allocation4], 128  }
  0x93   :  { %100 = vsyncadd [#allocation4], 4294967168 }
  0x94   :  { %48 = vsyncpa [#allocation3], 1 }
  0x95   :  { %49 = vsyncpa [#allocation4], 1 }

</bundles_post_ra>
